<compile_context>
chip_gen: v6e
topology: v6e:2x2x1
jax: 0.10.0
libtpu: 0.0.40
codegen_flags: <defaults>
</compile_context>

<pallas_src>
import jax
import jax.numpy as jnp
from jax.experimental import pallas as pl
from jax.experimental.pallas import tpu as pltpu
from typing import NamedTuple

# ----------------------------- configuration --------------------------------
MARGINALS = ((0, 1), (2, 3))        # two 2-dim marginals
NUM_FEATURES = 4                    # observation feature dim
HIDDEN = 32                         # hidden_features (per channel)
NUM_BLOCKS = 2                      # num_blocks
BN_EPS = 1e-5

C = len(MARGINALS)                  # number of marginals / channels
P = len(MARGINALS[0])               # params per marginal
F = NUM_FEATURES + P                # per-channel classifier input width
CP = C * P                          # packed marginal-parameter width
F_IN = NUM_FEATURES + CP            # packed [x | z] input width per batch row
CH = C * HIDDEN                     # channel-packed hidden width
NB2 = 2 * NUM_BLOCKS                # linears per residual stack

G = 4                               # batch rows folded into lanes (bf16 -> 256 lanes)
GCH = G * CH                        # folded hidden width (= 256)
GF_IN = G * F_IN                    # folded input width  (= 32)
GC = G * C                          # folded output width (= 8)

MAX_B_TILE = 4096                   # original batch rows per grid step (mult of G*16)
SPLIT_THRESHOLD = 1024              # above this, force >=2 grid steps (v7x megacore)


# ------------------------------ Pallas kernel --------------------------------
def _classifier_kernel(xz_ref, w0_ref, b0_ref, wblk_ref, bblk_ref,
                       sc0_ref, sh0_ref, wf_ref, bf_ref, o_ref):
    """Channel+batch-group packed residual MLP over one folded B tile."""
    bf16 = jnp.bfloat16

    # initial LinearWithChannel (packed [x | z] input, block-diag over groups)
    h = jnp.dot(xz_ref[...], w0_ref[...],
                preferred_element_type=jnp.float32) + b0_ref[...]       # (TBF, GCH) f32

    # residual blocks (static unroll); residual stream kept in f32
    for blk in range(NUM_BLOCKS):
        i0, i1 = 2 * blk, 2 * blk + 1
        # BatchNorm (eval) on the residual stream -- cannot be folded -- + relu
        t = jnp.maximum(h * sc0_ref[blk] + sh0_ref[blk], 0.0)
        # Linear0 with the following BatchNorm folded in, then relu
        t = jnp.maximum(
            jnp.dot(t.astype(bf16), wblk_ref[i0],
                    preferred_element_type=jnp.float32) + bblk_ref[i0], 0.0)
        # dropout is identity in eval mode
        t = jnp.dot(t.astype(bf16), wblk_ref[i1],
                    preferred_element_type=jnp.float32) + bblk_ref[i1]
        h = h + t

    # final LinearWithChannel (H -> 1) as one sparse-projection matmul -> (TBF, G*C)
    o_ref[...] = jnp.dot(h.astype(bf16), wf_ref[...],
                         preferred_element_type=jnp.float32) + bf_ref[...]


def _round_up(n, m):
    return (n + m - 1) // m * m


def _choose_tile(B):
    """Pick (tb, b_pad) in ORIGINAL batch rows; tb/G becomes the folded tile rows."""
    b_min = _round_up(B, G)
    if b_min > MAX_B_TILE:
        tb = MAX_B_TILE                                   # big batches: 4096-row tiles
    elif b_min >= SPLIT_THRESHOLD:
        # >=2 "parallel" grid steps so both v7x TensorCores get work
        tb = _round_up((b_min + 1) // 2, G * 16)
    else:
        tb = b_min                                        # single step, full-extent block
    b_pad = _round_up(b_min, tb)
    return tb, b_pad


def marginal_classifier(x, z_m, packed):
    """x: (B, NUM_FEATURES); z_m: (B, C, P). Returns logratios (B, C) float32."""
    w0g, b0g, wblk_g, bblk_g, sc0_g, sh0_g, wfm, bfr = packed
    B = x.shape[0]

    # single packed [x | z] input, bf16 (halves DMA bytes, MXU-native)
    xz = jnp.concatenate(
        [x.astype(jnp.float32), z_m.reshape(B, CP).astype(jnp.float32)], axis=-1)
    xz = xz.astype(jnp.bfloat16)                           # (B, F_IN)

    tb, b_pad = _choose_tile(B)
    if b_pad != B:
        xz = jnp.pad(xz, ((0, b_pad - B), (0, 0)))
    xzg = xz.reshape(b_pad // G, GF_IN)                    # fold G batch rows into lanes
    tbf = tb // G

    const2 = lambda i: (0, 0)
    const3 = lambda i: (0, 0, 0)

    out = pl.pallas_call(
        _classifier_kernel,
        out_shape=jax.ShapeDtypeStruct((b_pad // G, GC), jnp.float32),
        grid=(b_pad // tb,),
        in_specs=[
            pl.BlockSpec((tbf, GF_IN), lambda i: (i, 0)),          # folded [x|z] tile (bf16)
            pl.BlockSpec((GF_IN, GCH), const2),                    # W0 (packed, block-diag)
            pl.BlockSpec((1, GCH), const2),                        # b0 row (f32)
            pl.BlockSpec((NB2, GCH, GCH), const3),                 # block weights (BN folded, bf16)
            pl.BlockSpec((NB2, 1, GCH), const3),                   # block biases (f32)
            pl.BlockSpec((NUM_BLOCKS, 1, GCH), const3),            # residual-stream BN scale
            pl.BlockSpec((NUM_BLOCKS, 1, GCH), const3),            # residual-stream BN shift
            pl.BlockSpec((GCH, GC), const2),                       # head projection (bf16)
            pl.BlockSpec((1, GC), const2),                         # head bias row (f32)
        ],
        out_specs=pl.BlockSpec((tbf, GC), lambda i: (i, 0)),
        compiler_params=pltpu.CompilerParams(
            dimension_semantics=("parallel",),
            vmem_limit_bytes=32 * 1024 * 1024,   # safe on v5e/v6e/v7x; footprint is small
        ),
    )(xzg, w0g, b0g, wblk_g, bblk_g, sc0_g, sh0_g, wfm, bfr)

    # un-fold the batch groups: (b_pad/G, G*C) -> (b_pad, C)
    return out.reshape(b_pad, C)[:B]


# --------------------------- parameter preparation ---------------------------
def _block_diag(blocks):
    """List of 2-D arrays -> block-diagonal matrix."""
    rows = sum(b.shape[0] for b in blocks)
    cols = sum(b.shape[1] for b in blocks)
    out = jnp.zeros((rows, cols), blocks[0].dtype)
    r = c = 0
    for b in blocks:
        out = out.at[r:r + b.shape[0], c:c + b.shape[1]].set(b)
        r += b.shape[0]
        c += b.shape[1]
    return out


def init_raw_params(key):
    """Deterministic synthetic per-channel parameters (torch-module equivalent)."""
    ks = jax.random.split(key, 10)
    w0 = 0.2 * jax.random.normal(ks[0], (C, F, HIDDEN), jnp.float32)       # (in, out)
    b0 = 0.1 * jax.random.normal(ks[1], (C, HIDDEN), jnp.float32)
    wblk = 0.1 * jax.random.normal(ks[2], (C, NB2, HIDDEN, HIDDEN), jnp.float32)
    bblk = 0.05 * jax.random.normal(ks[3], (C, NB2, HIDDEN), jnp.float32)
    gamma = 1.0 + 0.05 * jax.random.normal(ks[4], (C, NB2, HIDDEN), jnp.float32)
    beta = 0.05 * jax.random.normal(ks[5], (C, NB2, HIDDEN), jnp.float32)
    rmean = 0.05 * jax.random.normal(ks[6], (C, NB2, HIDDEN), jnp.float32)
    rvar = 1.0 + 0.1 * jax.random.uniform(ks[7], (C, NB2, HIDDEN), jnp.float32)
    wf = 0.2 * jax.random.normal(ks[8], (C, HIDDEN), jnp.float32)
    bf = 0.1 * jax.random.normal(ks[9], (C,), jnp.float32)
    return (w0, b0, wblk, bblk, gamma, beta, rmean, rvar, wf, bf)


def prepare_params(raw):
    """One-time prep: eval-BN fold + channel packing + G-group block-diagonalization."""
    w0, b0, wblk, bblk, gamma, beta, rmean, rvar, wf, bf = raw
    f32, bf16 = jnp.float32, jnp.bfloat16
    sc = (gamma / jnp.sqrt(rvar + BN_EPS)).astype(f32)       # (C, NB2, H)
    sh = (beta - rmean * sc).astype(f32)

    # initial layer: pack [x | z] input; x rows dense over channels, z rows block-diag
    w0p = jnp.zeros((F_IN, CH), f32)
    for c in range(C):
        w0p = w0p.at[:NUM_FEATURES, c * HIDDEN:(c + 1) * HIDDEN].set(
            w0[c, :NUM_FEATURES, :])
        w0p = w0p.at[NUM_FEATURES + c * P:NUM_FEATURES + (c + 1) * P,
                     c * HIDDEN:(c + 1) * HIDDEN].set(w0[c, NUM_FEATURES:, :])
    w0g = _block_diag([w0p] * G).astype(bf16)                          # (G*F_IN, GCH)
    b0g = jnp.tile(b0.reshape(1, CH), (1, G)).astype(f32)              # (1, GCH)

    # residual blocks: fold post-linear BN (index 2*blk+1) into Linear0; the BN on the
    # residual stream (index 2*blk) stays as in-kernel scale/shift rows.
    wblk_g, bblk_g, sc0_g, sh0_g = [], [], [], []
    for blk in range(NUM_BLOCKS):
        i0, i1 = 2 * blk, 2 * blk + 1
        w1 = wblk[:, i0] * sc[:, i1][:, None, :]              # (C, H, H)
        b1 = bblk[:, i0] * sc[:, i1] + sh[:, i1]              # (C, H)
        w2 = wblk[:, i1]
        b2 = bblk[:, i1]
        w1_bd = _block_diag([w1[c] for c in range(C)])        # (CH, CH)
        w2_bd = _block_diag([w2[c] for c in range(C)])
        wblk_g.append(_block_diag([w1_bd] * G))               # (GCH, GCH)
        wblk_g.append(_block_diag([w2_bd] * G))
        bblk_g.append(jnp.tile(b1.reshape(1, CH), (1, G)))
        bblk_g.append(jnp.tile(b2.reshape(1, CH), (1, G)))
        sc0_g.append(jnp.tile(sc[:, i0].reshape(1, CH), (1, G)))
        sh0_g.append(jnp.tile(sh[:, i0].reshape(1, CH), (1, G)))
    wblk_g = jnp.stack(wblk_g).astype(bf16)                   # (NB2, GCH, GCH)
    bblk_g = jnp.stack(bblk_g).astype(f32)                    # (NB2, 1, GCH)
    sc0_g = jnp.stack(sc0_g).astype(f32)                      # (NUM_BLOCKS, 1, GCH)
    sh0_g = jnp.stack(sh0_g).astype(f32)

    # final head H->1 per channel as a sparse projection matrix (GCH, G*C)
    wfm = jnp.zeros((GCH, GC), f32)
    for g in range(G):
        for c in range(C):
            wfm = wfm.at[g * CH + c * HIDDEN:g * CH + (c + 1) * HIDDEN,
                         g * C + c].set(wf[c])
    wfm = wfm.astype(bf16)
    bfr = jnp.tile(bf.reshape(1, C), (1, G)).astype(f32)      # (1, G*C)

    return (w0g, b0g, wblk_g, bblk_g, sc0_g, sh0_g, wfm, bfr)


# ------------------------------- glue (JAX) ----------------------------------
def equalize_tensors(a, b):
    n, m = a.shape[0], b.shape[0]
    if n == m:
        return a, b
    if n == 1:
        return jnp.broadcast_to(a, (m,) + a.shape[1:]), b
    if m == 1:
        return a, jnp.broadcast_to(b, (n,) + b.shape[1:])
    if n < m:
        assert m % n == 0
        reps = (m // n,) + (1,) * (a.ndim - 1)
        return jnp.tile(a, reps), b
    assert n % m == 0
    reps = (n // m,) + (1,) * (b.ndim - 1)
    return a, jnp.tile(b, reps)


def parameter_transform(z):
    # ParameterTransform with online_z_score=False: gather marginal blocks.
    idx = jnp.array(MARGINALS, dtype=jnp.int32)      # (C, P)
    return z[:, idx]                                 # (B, C, P)


class LogRatioSamples(NamedTuple):
    logratios: jnp.ndarray     # (B, n_marginals)
    params: jnp.ndarray        # (B, n_marginals, n_block_params)
    parnames: tuple
    metadata: dict


def log_ratio_estimator_ndim(x, z, packed_params):
    """Forward pass of LogRatioEstimator_Ndim (eval mode)."""
    x, z = equalize_tensors(x, z)
    z_m = parameter_transform(z)                                    # (B, C, P)
    ratios = marginal_classifier(x, z_m, packed_params)             # (B, C)
    varnames = tuple(tuple(f"z[{i}]" for i in m) for m in MARGINALS)
    return LogRatioSamples(ratios, z_m, varnames,
                           {"type": "MarginalMLP", "marginals": MARGINALS})


# pure-JAX reference (unfolded, per-channel, f32) for sanity checking
def _reference(x, z_m, raw):
    w0, b0, wblk, bblk, gamma, beta, rmean, rvar, wf, bf = raw
    B = x.shape[0]
    sc = gamma / jnp.sqrt(rvar + BN_EPS)
    sh = beta - rmean * sc
    xb = jnp.broadcast_to(x[:, None, :], (B, C, NUM_FEATURES))
    comb = jnp.concatenate([xb, z_m], axis=-1)                      # (B, C, F)
    cbf = jnp.transpose(comb, (1, 0, 2))                            # (C, B, F)
    h = jnp.einsum("cbf,cfh->cbh", cbf, w0) + b0[:, None, :]
    for blk in range(NUM_BLOCKS):
        i0, i1 = 2 * blk, 2 * blk + 1
        t = jnp.maximum(h * sc[:, i0][:, None, :] + sh[:, i0][:, None, :], 0.0)
        t = jnp.einsum("cbh,chk->cbk", t, wblk[:, i0]) + bblk[:, i0][:, None, :]
        t = jnp.maximum(t * sc[:, i1][:, None, :] + sh[:, i1][:, None, :], 0.0)
        t = jnp.einsum("cbh,chk->cbk", t, wblk[:, i1]) + bblk[:, i1][:, None, :]
        h = h + t
    out = jnp.einsum("cbh,ch->cb", h, wf) + bf[:, None]
    return out.T                                                    # (B, C)


if __name__ == "__main__":
    key = jax.random.PRNGKey(0)
    k_x, k_z, k_p = jax.random.split(key, 3)

    B = 2
    x = jax.random.normal(k_x, (B, NUM_FEATURES), jnp.float32)   # observation features
    z = jax.random.normal(k_z, (B, 4), jnp.float32)              # 4 params -> 2 marginals of 2
    raw = init_raw_params(k_p)
    packed = prepare_params(raw)

    w = log_ratio_estimator_ndim(x, z, packed)
    jax.block_until_ready(w.logratios)

    # sanity check against pure-JAX f32 reference (bf16 kernel -> loosened tolerance)
    x_eq, z_eq = equalize_tensors(x, z)
    z_m = parameter_transform(z_eq)
    ref = _reference(x_eq, z_m, raw)
    assert w.logratios.shape == (B, C)
    assert w.params.shape == (B, C, P)
    assert jnp.allclose(w.logratios, ref, atol=5e-2, rtol=5e-2), (w.logratios, ref)

    print("KERNEL_OK")
</pallas_src>

<mosaic_0001>
module attributes {stable_mosaic.version = 11 : i64} {
  func.func @_classifier_kernel(%arg0: i32, %arg1: memref<1x32xbf16, #tpu.memory_space<vmem>>, %arg2: memref<32x256xbf16, #tpu.memory_space<vmem>>, %arg3: memref<1x256xf32, #tpu.memory_space<vmem>>, %arg4: memref<4x256x256xbf16, #tpu.memory_space<vmem>>, %arg5: memref<4x1x256xf32, #tpu.memory_space<vmem>>, %arg6: memref<2x1x256xf32, #tpu.memory_space<vmem>>, %arg7: memref<2x1x256xf32, #tpu.memory_space<vmem>>, %arg8: memref<256x8xbf16, #tpu.memory_space<vmem>>, %arg9: memref<1x8xf32, #tpu.memory_space<vmem>>, %arg10: memref<1x8xf32, #tpu.memory_space<vmem>>) attributes {dimension_semantics = [#tpu.dimension_semantics<parallel>], iteration_bounds = array<i64: 1>, scalar_prefetch = 0 : i64, scratch_operands = 0 : i64, tpu.core_type = #tpu.core_type<tc>, window_params = [{transform_indices = @transform_0, window_bounds = array<i64: 1, 32>}, {pipeline_mode = #tpu.pipeline_mode<synchronous>, transform_indices = @transform_1, window_bounds = array<i64: 32, 256>}, {pipeline_mode = #tpu.pipeline_mode<synchronous>, transform_indices = @transform_2, window_bounds = array<i64: 1, 256>}, {pipeline_mode = #tpu.pipeline_mode<synchronous>, transform_indices = @transform_3, window_bounds = array<i64: 4, 256, 256>}, {pipeline_mode = #tpu.pipeline_mode<synchronous>, transform_indices = @transform_4, window_bounds = array<i64: 4, 1, 256>}, {pipeline_mode = #tpu.pipeline_mode<synchronous>, transform_indices = @transform_5, window_bounds = array<i64: 2, 1, 256>}, {pipeline_mode = #tpu.pipeline_mode<synchronous>, transform_indices = @transform_6, window_bounds = array<i64: 2, 1, 256>}, {pipeline_mode = #tpu.pipeline_mode<synchronous>, transform_indices = @transform_7, window_bounds = array<i64: 256, 8>}, {pipeline_mode = #tpu.pipeline_mode<synchronous>, transform_indices = @transform_8, window_bounds = array<i64: 1, 8>}, {transform_indices = @transform_9, window_bounds = array<i64: 1, 8>}]} {
    %c0 = arith.constant 0 : index
    %c0_0 = arith.constant 0 : index
    %0 = vector.load %arg1[%c0, %c0_0] : memref<1x32xbf16, #tpu.memory_space<vmem>>, vector<1x32xbf16>
    %c0_1 = arith.constant 0 : index
    %c0_2 = arith.constant 0 : index
    %1 = vector.load %arg2[%c0_1, %c0_2] : memref<32x256xbf16, #tpu.memory_space<vmem>>, vector<32x256xbf16>
    %cst = arith.constant dense<0.000000e+00> : vector<1x256xf32>
    %2 = tpu.matmul %0, %1, %cst {dimension_numbers = #tpu.dot_dimension_numbers<[1], [0], [0], [1], [0, 0, 1, 1], [], []>} : vector<1x32xbf16>, vector<32x256xbf16>, vector<1x256xf32> -> vector<1x256xf32>
    %c0_3 = arith.constant 0 : index
    %c0_4 = arith.constant 0 : index
    %3 = vector.load %arg3[%c0_3, %c0_4] : memref<1x256xf32, #tpu.memory_space<vmem>>, vector<1x256xf32>
    %4 = arith.addf %2, %3 : vector<1x256xf32>
    %c0_5 = arith.constant 0 : index
    %c0_6 = arith.constant 0 : index
    %c0_7 = arith.constant 0 : index
    %5 = vector.load %arg6[%c0_5, %c0_6, %c0_7] : memref<2x1x256xf32, #tpu.memory_space<vmem>>, vector<1x1x256xf32>
    %6 = vector.shape_cast %5 : vector<1x1x256xf32> to vector<1x256xf32>
    %7 = arith.mulf %4, %6 : vector<1x256xf32>
    %c0_8 = arith.constant 0 : index
    %c0_9 = arith.constant 0 : index
    %c0_10 = arith.constant 0 : index
    %8 = vector.load %arg7[%c0_8, %c0_9, %c0_10] : memref<2x1x256xf32, #tpu.memory_space<vmem>>, vector<1x1x256xf32>
    %9 = vector.shape_cast %8 : vector<1x1x256xf32> to vector<1x256xf32>
    %10 = arith.addf %7, %9 : vector<1x256xf32>
    %cst_11 = arith.constant 0.000000e+00 : f32
    %11 = vector.broadcast %cst_11 : f32 to vector<1x256xf32>
    %12 = arith.maximumf %10, %11 : vector<1x256xf32>
    %13 = arith.truncf %12 : vector<1x256xf32> to vector<1x256xbf16>
    %c0_12 = arith.constant 0 : index
    %c0_13 = arith.constant 0 : index
    %c0_14 = arith.constant 0 : index
    %14 = vector.load %arg4[%c0_12, %c0_13, %c0_14] : memref<4x256x256xbf16, #tpu.memory_space<vmem>>, vector<1x256x256xbf16>
    %15 = vector.shape_cast %14 : vector<1x256x256xbf16> to vector<256x256xbf16>
    %cst_15 = arith.constant dense<0.000000e+00> : vector<1x256xf32>
    %16 = tpu.matmul %13, %15, %cst_15 {dimension_numbers = #tpu.dot_dimension_numbers<[1], [0], [0], [1], [0, 0, 1, 1], [], []>} : vector<1x256xbf16>, vector<256x256xbf16>, vector<1x256xf32> -> vector<1x256xf32>
    %c0_16 = arith.constant 0 : index
    %c0_17 = arith.constant 0 : index
    %c0_18 = arith.constant 0 : index
    %17 = vector.load %arg5[%c0_16, %c0_17, %c0_18] : memref<4x1x256xf32, #tpu.memory_space<vmem>>, vector<1x1x256xf32>
    %18 = vector.shape_cast %17 : vector<1x1x256xf32> to vector<1x256xf32>
    %19 = arith.addf %16, %18 : vector<1x256xf32>
    %cst_19 = arith.constant 0.000000e+00 : f32
    %20 = vector.broadcast %cst_19 : f32 to vector<1x256xf32>
    %21 = arith.maximumf %19, %20 : vector<1x256xf32>
    %22 = arith.truncf %21 : vector<1x256xf32> to vector<1x256xbf16>
    %c1 = arith.constant 1 : index
    %c0_20 = arith.constant 0 : index
    %c0_21 = arith.constant 0 : index
    %23 = vector.load %arg4[%c1, %c0_20, %c0_21] : memref<4x256x256xbf16, #tpu.memory_space<vmem>>, vector<1x256x256xbf16>
    %24 = vector.shape_cast %23 : vector<1x256x256xbf16> to vector<256x256xbf16>
    %cst_22 = arith.constant dense<0.000000e+00> : vector<1x256xf32>
    %25 = tpu.matmul %22, %24, %cst_22 {dimension_numbers = #tpu.dot_dimension_numbers<[1], [0], [0], [1], [0, 0, 1, 1], [], []>} : vector<1x256xbf16>, vector<256x256xbf16>, vector<1x256xf32> -> vector<1x256xf32>
    %c1_23 = arith.constant 1 : index
    %c0_24 = arith.constant 0 : index
    %c0_25 = arith.constant 0 : index
    %26 = vector.load %arg5[%c1_23, %c0_24, %c0_25] : memref<4x1x256xf32, #tpu.memory_space<vmem>>, vector<1x1x256xf32>
    %27 = vector.shape_cast %26 : vector<1x1x256xf32> to vector<1x256xf32>
    %28 = arith.addf %25, %27 : vector<1x256xf32>
    %29 = arith.addf %4, %28 : vector<1x256xf32>
    %c1_26 = arith.constant 1 : index
    %c0_27 = arith.constant 0 : index
    %c0_28 = arith.constant 0 : index
    %30 = vector.load %arg6[%c1_26, %c0_27, %c0_28] : memref<2x1x256xf32, #tpu.memory_space<vmem>>, vector<1x1x256xf32>
    %31 = vector.shape_cast %30 : vector<1x1x256xf32> to vector<1x256xf32>
    %32 = arith.mulf %29, %31 : vector<1x256xf32>
    %c1_29 = arith.constant 1 : index
    %c0_30 = arith.constant 0 : index
    %c0_31 = arith.constant 0 : index
    %33 = vector.load %arg7[%c1_29, %c0_30, %c0_31] : memref<2x1x256xf32, #tpu.memory_space<vmem>>, vector<1x1x256xf32>
    %34 = vector.shape_cast %33 : vector<1x1x256xf32> to vector<1x256xf32>
    %35 = arith.addf %32, %34 : vector<1x256xf32>
    %cst_32 = arith.constant 0.000000e+00 : f32
    %36 = vector.broadcast %cst_32 : f32 to vector<1x256xf32>
    %37 = arith.maximumf %35, %36 : vector<1x256xf32>
    %38 = arith.truncf %37 : vector<1x256xf32> to vector<1x256xbf16>
    %c2 = arith.constant 2 : index
    %c0_33 = arith.constant 0 : index
    %c0_34 = arith.constant 0 : index
    %39 = vector.load %arg4[%c2, %c0_33, %c0_34] : memref<4x256x256xbf16, #tpu.memory_space<vmem>>, vector<1x256x256xbf16>
    %40 = vector.shape_cast %39 : vector<1x256x256xbf16> to vector<256x256xbf16>
    %cst_35 = arith.constant dense<0.000000e+00> : vector<1x256xf32>
    %41 = tpu.matmul %38, %40, %cst_35 {dimension_numbers = #tpu.dot_dimension_numbers<[1], [0], [0], [1], [0, 0, 1, 1], [], []>} : vector<1x256xbf16>, vector<256x256xbf16>, vector<1x256xf32> -> vector<1x256xf32>
    %c2_36 = arith.constant 2 : index
    %c0_37 = arith.constant 0 : index
    %c0_38 = arith.constant 0 : index
    %42 = vector.load %arg5[%c2_36, %c0_37, %c0_38] : memref<4x1x256xf32, #tpu.memory_space<vmem>>, vector<1x1x256xf32>
    %43 = vector.shape_cast %42 : vector<1x1x256xf32> to vector<1x256xf32>
    %44 = arith.addf %41, %43 : vector<1x256xf32>
    %cst_39 = arith.constant 0.000000e+00 : f32
    %45 = vector.broadcast %cst_39 : f32 to vector<1x256xf32>
    %46 = arith.maximumf %44, %45 : vector<1x256xf32>
    %47 = arith.truncf %46 : vector<1x256xf32> to vector<1x256xbf16>
    %c3 = arith.constant 3 : index
    %c0_40 = arith.constant 0 : index
    %c0_41 = arith.constant 0 : index
    %48 = vector.load %arg4[%c3, %c0_40, %c0_41] : memref<4x256x256xbf16, #tpu.memory_space<vmem>>, vector<1x256x256xbf16>
    %49 = vector.shape_cast %48 : vector<1x256x256xbf16> to vector<256x256xbf16>
    %cst_42 = arith.constant dense<0.000000e+00> : vector<1x256xf32>
    %50 = tpu.matmul %47, %49, %cst_42 {dimension_numbers = #tpu.dot_dimension_numbers<[1], [0], [0], [1], [0, 0, 1, 1], [], []>} : vector<1x256xbf16>, vector<256x256xbf16>, vector<1x256xf32> -> vector<1x256xf32>
    %c3_43 = arith.constant 3 : index
    %c0_44 = arith.constant 0 : index
    %c0_45 = arith.constant 0 : index
    %51 = vector.load %arg5[%c3_43, %c0_44, %c0_45] : memref<4x1x256xf32, #tpu.memory_space<vmem>>, vector<1x1x256xf32>
    %52 = vector.shape_cast %51 : vector<1x1x256xf32> to vector<1x256xf32>
    %53 = arith.addf %50, %52 : vector<1x256xf32>
    %54 = arith.addf %29, %53 : vector<1x256xf32>
    %55 = arith.truncf %54 : vector<1x256xf32> to vector<1x256xbf16>
    %c0_46 = arith.constant 0 : index
    %c0_47 = arith.constant 0 : index
    %56 = vector.load %arg8[%c0_46, %c0_47] : memref<256x8xbf16, #tpu.memory_space<vmem>>, vector<256x8xbf16>
    %cst_48 = arith.constant dense<0.000000e+00> : vector<1x8xf32>
    %57 = tpu.matmul %55, %56, %cst_48 {dimension_numbers = #tpu.dot_dimension_numbers<[1], [0], [0], [1], [0, 0, 1, 1], [], []>} : vector<1x256xbf16>, vector<256x8xbf16>, vector<1x8xf32> -> vector<1x8xf32>
    %c0_49 = arith.constant 0 : index
    %c0_50 = arith.constant 0 : index
    %58 = vector.load %arg9[%c0_49, %c0_50] : memref<1x8xf32, #tpu.memory_space<vmem>>, vector<1x8xf32>
    %59 = arith.addf %57, %58 : vector<1x8xf32>
    %c0_51 = arith.constant 0 : index
    %c0_52 = arith.constant 0 : index
    %60 = vector.load %arg10[%c0_51, %c0_52] : memref<1x8xf32, #tpu.memory_space<vmem>>, vector<1x8xf32>
    tpu.vector_store %arg10[%c0_51, %c0_52], %59 {strides = array<i32>} : memref<1x8xf32, #tpu.memory_space<vmem>>, vector<1x8xf32>,
    return
  }
  func.func @transform_0(%arg0: i32) -> (i32, i32) {
    %c0_i32 = arith.constant 0 : i32
    %c0_i32_0 = arith.constant 0 : i32
    return %arg0, %c0_i32 : i32, i32
  }
  func.func @transform_1(%arg0: i32) -> (i32, i32) {
    %c0_i32 = arith.constant 0 : i32
    %c0_i32_0 = arith.constant 0 : i32
    %c0_i32_1 = arith.constant 0 : i32
    return %c0_i32, %c0_i32_0 : i32, i32
  }
  func.func @transform_2(%arg0: i32) -> (i32, i32) {
    %c0_i32 = arith.constant 0 : i32
    %c0_i32_0 = arith.constant 0 : i32
    %c0_i32_1 = arith.constant 0 : i32
    return %c0_i32, %c0_i32_0 : i32, i32
  }
  func.func @transform_3(%arg0: i32) -> (i32, i32, i32) {
    %c0_i32 = arith.constant 0 : i32
    %c0_i32_0 = arith.constant 0 : i32
    %c0_i32_1 = arith.constant 0 : i32
    %c0_i32_2 = arith.constant 0 : i32
    return %c0_i32, %c0_i32_0, %c0_i32_1 : i32, i32, i32
  }
  func.func @transform_4(%arg0: i32) -> (i32, i32, i32) {
    %c0_i32 = arith.constant 0 : i32
    %c0_i32_0 = arith.constant 0 : i32
    %c0_i32_1 = arith.constant 0 : i32
    %c0_i32_2 = arith.constant 0 : i32
    return %c0_i32, %c0_i32_0, %c0_i32_1 : i32, i32, i32
  }
  func.func @transform_5(%arg0: i32) -> (i32, i32, i32) {
    %c0_i32 = arith.constant 0 : i32
    %c0_i32_0 = arith.constant 0 : i32
    %c0_i32_1 = arith.constant 0 : i32
    %c0_i32_2 = arith.constant 0 : i32
    return %c0_i32, %c0_i32_0, %c0_i32_1 : i32, i32, i32
  }
  func.func @transform_6(%arg0: i32) -> (i32, i32, i32) {
    %c0_i32 = arith.constant 0 : i32
    %c0_i32_0 = arith.constant 0 : i32
    %c0_i32_1 = arith.constant 0 : i32
    %c0_i32_2 = arith.constant 0 : i32
    return %c0_i32, %c0_i32_0, %c0_i32_1 : i32, i32, i32
  }
  func.func @transform_7(%arg0: i32) -> (i32, i32) {
    %c0_i32 = arith.constant 0 : i32
    %c0_i32_0 = arith.constant 0 : i32
    %c0_i32_1 = arith.constant 0 : i32
    return %c0_i32, %c0_i32_0 : i32, i32
  }
  func.func @transform_8(%arg0: i32) -> (i32, i32) {
    %c0_i32 = arith.constant 0 : i32
    %c0_i32_0 = arith.constant 0 : i32
    %c0_i32_1 = arith.constant 0 : i32
    return %c0_i32, %c0_i32_0 : i32, i32
  }
  func.func @transform_9(%arg0: i32) -> (i32, i32) {
    %c0_i32 = arith.constant 0 : i32
    %c0_i32_0 = arith.constant 0 : i32
    return %arg0, %c0_i32 : i32, i32
  }
}

</mosaic_0001>

<bundles_post_ra>
// kernel: tpu_custom_call.1
= control target key start
LH: loop header
LB: loop body
LE: loop exit
PB: predicated region body
PF: predicated region fallthrough
CT: control target
= control target key end

     0   :  { %14 = vsyncpa [#allocation3], 0  ;;  %s2013_s0 = inlined_call_operand.vmem [shape: bf16[1,32], index: 0, kind: input, shape index: {}]   ;;  %s2014_s1 = inlined_call_operand.vmem [shape: bf16[32,256], index: 1, kind: input, shape index: {}]   ;;  %s2015_s2 = inlined_call_operand.vmem [shape: f32[1,256], index: 2, kind: input, shape index: {}]   ;;  %s2016_s3 = inlined_call_operand.hbm [shape: bf16[4,256,256], index: 3, kind: input, shape index: {}]   ;;  %s2017_s4 = inlined_call_operand.vmem [shape: f32[4,1,256], index: 4, kind: input, shape index: {}]   ;;  %s2018_s5 = inlined_call_operand.vmem [shape: f32[2,1,256], index: 5, kind: input, shape index: {}]   ;;  %s2019_s6 = inlined_call_operand.vmem [shape: f32[2,1,256], index: 6, kind: input, shape index: {}]   ;;  %s2020_s7 = inlined_call_operand.vmem [shape: bf16[256,8], index: 7, kind: input, shape index: {}]   ;;  %s2021_s8 = inlined_call_operand.vmem [shape: f32[1,8], index: 8, kind: input, shape index: {}]   ;;  %s2022_s9 = inlined_call_operand.hbm [shape: f32[1,8], index: 9, kind: output, shape index: {}]  }
   0x1   :  { %15 = vsyncpa [#allocation4], 0  ;;  %s1821_s30 = smov [#allocation2]  }
   0x2   :  { %s27_s10 = sshll.u32 %s1821_s30, 4  ;;  %s28_s10 = int_to_ptr.vmem [resolvable:$true] %s27_s10 }
   0x3   :  { %s1785_s11 = scalar_lea.vmem %s28_s10, 16384  ;;  %p1790_p1 = scmp.lt.s32.totalorder %s28_s10, %s28_s10 }
   0x4   :  { %p1786_p0 = scmp.ne.s32.totalorder %s28_s10, %s1785_s11  ;;  %p1791_p2 = scmp.lt.s32.totalorder %s1785_s11, %s1785_s11 }
   0x6   :  { %p1792_p3 = por %p1791_p2, %p1790_p1 }
   0x8   :  { %p1793_p4 = pnand %p1792_p3, %p1786_p0 }
   0xa   :  { %1796 = shalt.err (!%p1793_p4)
}
   0xb   :  { %s1822_s12 = smov 128   ;;  %s1823_s13 = smov 8  }
   0xc   :  { %33 = dma.hbm_to_vmem [thread:$0]  %s2016_s3, 16384, %s28_s10, [#allocation3], %s1822_s12, %s1822_s12, %s1823_s13  }
   0xd   :  { %1817 = dma.done.wait [#allocation3], 16384  }
   0xe   :  { %1818 = vsyncadd [#allocation3], 4294950912  ;;  %v1824_v0 = vmov 0   ;;  %v1563_v1 = vld [vmem:[%s2014_s1 + $0x14] ss:$8 sps:$4 sm:$0xff]   ;;  %vm85_vm0 = vcmask 261120  }
   0xf   :  { %121 = vmatprep.mubr.bf16.mxu0 %v1824_v0  ;;  %v1565_v2 = vld [vmem:[%s2014_s1 + $0x10] ss:$8 sps:$4 sm:$0xff]   ;;  %101 = vmatprep.subr.bf16.mxu0 %v1563_v1  ;;  %v1566_v3 = vld [vmem:[%s2014_s1 + $0x4] ss:$8 sps:$4 sm:$0xff]   ;;  %v1568_v4 = vld [vmem:[%s2014_s1] ss:$8 sps:$4 sm:$0xff]  }
  0x10   :  { %102 = vmatpush1.bf16.msra.mxu0 %v1565_v2  ;;  %v1569_v5 = vld [vmem:[#allocation2 + $0x74] ss:$8 sps:$4 sm:$0xff]   ;;  %v1571_v6 = vld [vmem:[#allocation2 + $0x70] ss:$8 sps:$4 sm:$0xff]   ;;  %v1572_v7 = vld [vmem:[#allocation2 + $0x64] ss:$8 sps:$4 sm:$0xff]   ;;  %v75_v2 = vlaneseq }
  0x11   :  { %103 = vmatprep.subr.bf16.mxu0 %v1566_v3  ;;  %366 = vmatprep.subr.bf16.mxu1 %v1569_v5  ;;  %v48_v8 = vld [vmem:[%s2013_s0] sm:$0x1]  ;;  %v1575_v10 = vld [vmem:[#allocation2 + $0x54] ss:$8 sps:$4 sm:$0xff]   ;;  %v1577_v11 = vld [vmem:[#allocation2 + $0x50] ss:$8 sps:$4 sm:$0xff]  }
  0x12   :  { %367 = vmatpush1.bf16.msra.mxu1 %v1571_v6  ;;  %v1574_v9 = vld [vmem:[#allocation2 + $0x60] ss:$8 sps:$4 sm:$0xff]   ;;  %v1578_v12 = vld [vmem:[#allocation2 + $0x44] ss:$8 sps:$4 sm:$0xff]   ;;  %v1581_v14 = vld [vmem:[#allocation2 + $0x34] ss:$8 sps:$4 sm:$0xff]  }
  0x13   :  { %368 = vmatprep.subr.bf16.mxu1 %v1572_v7  ;;  %v1580_v13 = vld [vmem:[#allocation2 + $0x40] ss:$8 sps:$4 sm:$0xff]   ;;  %v1583_v15 = vld [vmem:[#allocation2 + $0x30] ss:$8 sps:$4 sm:$0xff]   ;;  %v1584_v16 = vld [vmem:[#allocation2 + $0x24] ss:$8 sps:$4 sm:$0xff]  }
  0x14   :  { %104 = vmatpush1.bf16.msra.mxu0 %v1568_v4  ;;  %v1586_v17 = vld [vmem:[#allocation2 + $0x20] ss:$8 sps:$4 sm:$0xff]   ;;  %v1587_v18 = vld [vmem:[#allocation2 + $0x14] ss:$8 sps:$4 sm:$0xff]   ;;  %v1589_v19 = vld [vmem:[#allocation2 + $0x10] ss:$8 sps:$4 sm:$0xff]  }
  0x15   :  { %v1590_v20 = vld [vmem:[#allocation2 + $0x4] ss:$8 sps:$4 sm:$0xff]   ;;  %v1592_v21 = vld [vmem:[#allocation2] ss:$8 sps:$4 sm:$0xff]   ;;  %v1593_v22 = vld [vmem:[#allocation2 + $0xf4] ss:$8 sps:$4 sm:$0xff]  }
  0x16   :  { %369 = vmatpush1.bf16.msra.mxu1 %v1574_v9  ;;  %v1595_v23 = vld [vmem:[#allocation2 + $0xf0] ss:$8 sps:$4 sm:$0xff]   ;;  %v1596_v24 = vld [vmem:[#allocation2 + $0xe4] ss:$8 sps:$4 sm:$0xff]   ;;  %v1598_v25 = vld [vmem:[#allocation2 + $0xe0] ss:$8 sps:$4 sm:$0xff]  }
  0x17   :  { %1386 = vmatmul.mubr.msk.bf16.vlgmr.msra.gmra.mxu0 %vm85_vm0, %v48_v8  ;;  %370 = vmatprep.subr.bf16.mxu1 %v1575_v10  ;;  %v1599_v26 = vld [vmem:[#allocation2 + $0xd4] ss:$8 sps:$4 sm:$0xff]   ;;  %v1601_v27 = vld [vmem:[#allocation2 + $0xd0] ss:$8 sps:$4 sm:$0xff]   ;;  %v1602_v28 = vld [vmem:[#allocation2 + $0xc4] ss:$8 sps:$4 sm:$0xff]  }
  0x18   :  { %v1604_v29 = vld [vmem:[#allocation2 + $0xc0] ss:$8 sps:$4 sm:$0xff]   ;;  %v1605_v30 = vld [vmem:[#allocation2 + $0xb4] ss:$8 sps:$4 sm:$0xff]   ;;  %v1607_v31 = vld [vmem:[#allocation2 + $0xb0] ss:$8 sps:$4 sm:$0xff]  }
  0x19   :  { %v1608_v32 = vld [vmem:[#allocation2 + $0xa4] ss:$8 sps:$4 sm:$0xff]   ;;  %v1610_v33 = vld [vmem:[#allocation2 + $0xa0] ss:$8 sps:$4 sm:$0xff]   ;;  %v1611_v34 = vld [vmem:[#allocation2 + $0x94] ss:$8 sps:$4 sm:$0xff]  }
  0x1a   :  { %371 = vmatpush1.bf16.msra.mxu1 %v1577_v11  ;;  %v1613_v35 = vld [vmem:[#allocation2 + $0x90] ss:$8 sps:$4 sm:$0xff]   ;;  %v1614_v36 = vld [vmem:[#allocation2 + $0x84] ss:$8 sps:$4 sm:$0xff]   ;;  %v1616_v37 = vld [vmem:[#allocation2 + $0x80] ss:$8 sps:$4 sm:$0xff]  }
  0x1b   :  { %372 = vmatprep.subr.bf16.mxu1 %v1578_v12  ;;  %v1617_v38 = vld [vmem:[#allocation2 + $0x170] ss:$8 sps:$4 sm:$0xff]   ;;  %v1619_v39 = vld [vmem:[#allocation2 + $0x174] ss:$8 sps:$4 sm:$0xff]   ;;  %v1622_v40 = vld [vmem:[#allocation2 + $0x164] ss:$8 sps:$4 sm:$0xff]  }
  0x1c   :  { %617 = vmatprep.subr.bf16.mxu0 %v1619_v39  ;;  %v1620_v41 = vld [vmem:[#allocation2 + $0x160] ss:$8 sps:$4 sm:$0xff]   ;;  %v1625_v42 = vld [vmem:[#allocation2 + $0x154] ss:$8 sps:$4 sm:$0xff]   ;;  %v1623_v43 = vld [vmem:[#allocation2 + $0x150] ss:$8 sps:$4 sm:$0xff]  }
  0x1d   :  { %618 = vmatpush1.bf16.msra.mxu0 %v1617_v38  ;;  %v1628_v44 = vld [vmem:[#allocation2 + $0x144] ss:$8 sps:$4 sm:$0xff]   ;;  %v1626_v45 = vld [vmem:[#allocation2 + $0x140] ss:$8 sps:$4 sm:$0xff]   ;;  %v1631_v46 = vld [vmem:[#allocation2 + $0x134] ss:$8 sps:$4 sm:$0xff]  }
  0x1e   :  { %373 = vmatpush1.bf16.msra.mxu1 %v1580_v13  ;;  %619 = vmatprep.subr.bf16.mxu0 %v1622_v40  ;;  %v1629_v47 = vld [vmem:[#allocation2 + $0x130] ss:$8 sps:$4 sm:$0xff]   ;;  %v1634_v48 = vld [vmem:[#allocation2 + $0x124] ss:$8 sps:$4 sm:$0xff]   ;;  %v1632_v49 = vld [vmem:[#allocation2 + $0x120] ss:$8 sps:$4 sm:$0xff]  }
  0x1f   :  { %374 = vmatprep.subr.bf16.mxu1 %v1581_v14  ;;  %v1637_v50 = vld [vmem:[#allocation2 + $0x114] ss:$8 sps:$4 sm:$0xff]   ;;  %v1635_v51 = vld [vmem:[#allocation2 + $0x110] ss:$8 sps:$4 sm:$0xff]   ;;  %v1640_v52 = vld [vmem:[#allocation2 + $0x104] ss:$8 sps:$4 sm:$0xff]  }
  0x20   :  { %v1638_v53 = vld [vmem:[#allocation2 + $0x100] ss:$8 sps:$4 sm:$0xff]   ;;  %v1643_v54 = vld [vmem:[#allocation2 + $0x1f4] ss:$8 sps:$4 sm:$0xff]   ;;  %v1641_v55 = vld [vmem:[#allocation2 + $0x1f0] ss:$8 sps:$4 sm:$0xff]  }
  0x21   :  { %620 = vmatpush1.bf16.msra.mxu0 %v1620_v41  ;;  %v1646_v56 = vld [vmem:[#allocation2 + $0x1e4] ss:$8 sps:$4 sm:$0xff]   ;;  %v1644_v57 = vld [vmem:[#allocation2 + $0x1e0] ss:$8 sps:$4 sm:$0xff]   ;;  %v1649_v58 = vld [vmem:[#allocation2 + $0x1d4] ss:$8 sps:$4 sm:$0xff]  }
  0x22   :  { %375 = vmatpush1.bf16.msra.mxu1 %v1583_v15  ;;  %621 = vmatprep.subr.bf16.mxu0 %v1625_v42  ;;  %v1647_v59 = vld [vmem:[#allocation2 + $0x1d0] ss:$8 sps:$4 sm:$0xff]   ;;  %v1652_v60 = vld [vmem:[#allocation2 + $0x1c4] ss:$8 sps:$4 sm:$0xff]   ;;  %v1650_v61 = vld [vmem:[#allocation2 + $0x1c0] ss:$8 sps:$4 sm:$0xff]  }
  0x23   :  { %376 = vmatprep.subr.bf16.mxu1 %v1584_v16  ;;  %v1655_v62 = vld [vmem:[#allocation2 + $0x1b4] ss:$8 sps:$4 sm:$0xff]   ;;  %v1653_v63 = vld [vmem:[#allocation2 + $0x1b0] ss:$8 sps:$4 sm:$0xff]   ;;  %v1658_v0 = vld [vmem:[#allocation2 + $0x1a4] ss:$8 sps:$4 sm:$0xff]  }
  0x24   :  { %v1656_v1 = vld [vmem:[#allocation2 + $0x1a0] ss:$8 sps:$4 sm:$0xff]   ;;  %v76_v3 = vshrl.u32 %v75_v2, 7  ;;  %v1671_v38 = vld [vmem:[#allocation2 + $0x250] ss:$8 sps:$4 sm:$0xff]   ;;  %s1825_s22 = smov [#allocation5]  }
  0x25   :  { %622 = vmatpush1.bf16.msra.mxu0 %v1623_v43  ;;  %v53_v5 = vld [vmem:[%s2015_s2] sm:$0x3]  ;;  %v1676_v39 = vld [vmem:[#allocation2 + $0x244] ss:$8 sps:$4 sm:$0xff]   ;;  %v1679_v41 = vld [vmem:[#allocation2 + $0x234] ss:$8 sps:$4 sm:$0xff]  }
  0x26   :  { %377 = vmatpush1.bf16.msra.mxu1 %v1586_v17  ;;  %623 = vmatprep.subr.bf16.mxu0 %v1628_v44  ;;  %v1894_v4 = vsub.s32 0, %v76_v3  ;;  %v1899_v6 = vsub.s32 1, %v76_v3  ;;  %v130_v7 = vld [vmem:[%s2018_s5] sm:$0x3]  ;;  %v1677_v42 = vld [vmem:[#allocation2 + $0x230] ss:$8 sps:$4 sm:$0xff]  }
  0x27   :  { %378 = vmatprep.subr.bf16.mxu1 %v1587_v18  ;;  %v144_v9 = vld [vmem:[%s2019_s6] sm:$0x3]  ;;  %v1682_v43 = vld [vmem:[#allocation2 + $0x224] ss:$8 sps:$4 sm:$0xff]   ;;  %s1373_s23 = sshll.u32 %s1825_s22, 4  ;;  %vm1365_vm1 = vcmask 57344   ;;  %s1374_s23 = int_to_ptr.vmem [resolvable:$true] %s1373_s23 }
  0x28   :  { %v78_v8 = vrot.slane %v53_v5, %v1894_v4  ;;  %v135_v10 = vrot.slane %v130_v7, %v1894_v4  ;;  %v82_v11 = vrot.slane %v53_v5, %v1899_v6  ;;  %v139_v14 = vrot.slane %v130_v7, %v1899_v6  ;;  %v1674_v40 = vld [vmem:[#allocation2 + $0x240] ss:$8 sps:$4 sm:$0xff]   ;;  %s1797_s3 = scalar_lea.vmem %s1374_s23, 16  ;;  %s1801_s24 = scalar_lea.vmem %s1374_s23, 32 }
  0x29   :  { %624 = vmatpush1.bf16.msra.mxu0 %v1626_v45  ;;  %v149_v15 = vrot.slane %v144_v9, %v1894_v4  ;;  %v1680_v44 = vld [vmem:[#allocation2 + $0x220] ss:$8 sps:$4 sm:$0xff]   ;;  %v1685_v45 = vld [vmem:[#allocation2 + $0x214] ss:$8 sps:$4 sm:$0xff]   ;;  %p1798_p5 = scmp.ne.s32.totalorder %s1374_s23, %s1797_s3  ;;  %p1802_p6 = scmp.lt.s32.totalorder %s1374_s23, %s1374_s23 }
  0x2a   :  { %379 = vmatpush1.bf16.msra.mxu1 %v1589_v19  ;;  %625 = vmatprep.subr.bf16.mxu0 %v1631_v46  ;;  %v153_v19 = vrot.slane %v144_v9, %v1899_v6  ;;  %v1683_v46 = vld [vmem:[#allocation2 + $0x210] ss:$8 sps:$4 sm:$0xff]   ;;  %p1803_p7 = scmp.lt.s32.totalorder %s1801_s24, %s1797_s3 }
  0x2b   :  { %380 = vmatprep.subr.bf16.mxu1 %v1590_v20  ;;  %v1701_v9 = vld [vmem:[#allocation2 + $0x2b0] ss:$8 sps:$4 sm:$0xff]  }
  0x2c   :  { %p1804_p8 = por %p1803_p7, %p1802_p6 }
  0x2d   :  { %626 = vmatpush1.bf16.msra.mxu0 %v1629_v47  ;;  %v1688_v47 = vld [vmem:[#allocation2 + $0x204] ss:$8 sps:$4 sm:$0xff]  }
  0x2e   :  { %381 = vmatpush1.bf16.msra.mxu1 %v1592_v21  ;;  %627 = vmatprep.subr.bf16.mxu0 %v1634_v48  ;;  %v1686_v48 = vld [vmem:[#allocation2 + $0x200] ss:$8 sps:$4 sm:$0xff]   ;;  %p1805_p9 = pnand %p1804_p8, %p1798_p5 }
  0x2f   :  { %382 = vmatprep.subr.bf16.mxu1 %v1593_v22 }
  0x31   :  { %628 = vmatpush1.bf16.msra.mxu0 %v1632_v49  ;;  %v1691_v49 = vld [vmem:[#allocation2 + $0x2f4] ss:$8 sps:$4 sm:$0xff]  }
  0x32   :  { %383 = vmatpush2.bf16.msra.mxu1 %v1595_v23  ;;  %629 = vmatprep.subr.bf16.mxu0 %v1637_v50  ;;  %v1689_v50 = vld [vmem:[#allocation2 + $0x2f0] ss:$8 sps:$4 sm:$0xff]  }
  0x33   :  { %384 = vmatprep.subr.bf16.mxu1 %v1596_v24 }
  0x35   :  { %630 = vmatpush1.bf16.msra.mxu0 %v1635_v51  ;;  %v1694_v51 = vld [vmem:[#allocation2 + $0x2e4] ss:$8 sps:$4 sm:$0xff]  }
  0x36   :  { %385 = vmatpush2.bf16.msra.mxu1 %v1598_v25  ;;  %631 = vmatprep.subr.bf16.mxu0 %v1640_v52  ;;  %v1692_v52 = vld [vmem:[#allocation2 + $0x2e0] ss:$8 sps:$4 sm:$0xff]  }
  0x37   :  { %386 = vmatprep.subr.bf16.mxu1 %v1599_v26 }
  0x39   :  { %632 = vmatpush1.bf16.msra.mxu0 %v1638_v53  ;;  %v1697_v53 = vld [vmem:[#allocation2 + $0x2d4] ss:$8 sps:$4 sm:$0xff]  }
  0x3a   :  { %387 = vmatpush2.bf16.msra.mxu1 %v1601_v27  ;;  %633 = vmatprep.subr.bf16.mxu0 %v1643_v54  ;;  %v1695_v54 = vld [vmem:[#allocation2 + $0x2d0] ss:$8 sps:$4 sm:$0xff]  }
  0x3b   :  { %388 = vmatprep.subr.bf16.mxu1 %v1602_v28 }
  0x3d   :  { %634 = vmatpush2.bf16.msra.mxu0 %v1641_v55  ;;  %v1700_v55 = vld [vmem:[#allocation2 + $0x2c4] ss:$8 sps:$4 sm:$0xff]  }
  0x3e   :  { %389 = vmatpush2.bf16.msra.mxu1 %v1604_v29  ;;  %635 = vmatprep.subr.bf16.mxu0 %v1646_v56  ;;  %v1661_v29 = vld [vmem:[#allocation2 + $0x194] ss:$8 sps:$4 sm:$0xff]   ;;  %v1698_v56 = vld [vmem:[#allocation2 + $0x2c0] ss:$8 sps:$4 sm:$0xff]  }
  0x3f   :  { %390 = vmatprep.subr.bf16.mxu1 %v1605_v30  ;;  %v1659_v30 = vld [vmem:[#allocation2 + $0x190] ss:$8 sps:$4 sm:$0xff]  }
  0x41   :  { %636 = vmatpush2.bf16.msra.mxu0 %v1644_v57  ;;  %v194_v57 = vld [vmem:[%s2017_s4] sm:$0x3] }
  0x42   :  { %391 = vmatpush2.bf16.msra.mxu1 %v1607_v31  ;;  %637 = vmatprep.subr.bf16.mxu0 %v1649_v58  ;;  %v1664_v31 = vld [vmem:[#allocation2 + $0x184] ss:$8 sps:$4 sm:$0xff]   ;;  %v359_v58 = vrot.slane %v194_v57, %v1894_v4 }
  0x43   :  { %392 = vmatprep.subr.bf16.mxu1 %v1608_v32  ;;  %v1662_v32 = vld [vmem:[#allocation2 + $0x180] ss:$8 sps:$4 sm:$0xff]  }
  0x45   :  { %638 = vmatpush2.bf16.msra.mxu0 %v1647_v59  ;;  %v363_v59 = vrot.slane %v194_v57, %v1899_v6 }
  0x46   :  { %393 = vmatpush2.bf16.msra.mxu1 %v1610_v33  ;;  %639 = vmatprep.subr.bf16.mxu0 %v1652_v60  ;;  %v1665_v33 = vld [vmem:[#allocation2 + $0x270] ss:$8 sps:$4 sm:$0xff]  }
  0x47   :  { %394 = vmatprep.subr.bf16.mxu1 %v1611_v34  ;;  %v1667_v34 = vld [vmem:[#allocation2 + $0x274] ss:$8 sps:$4 sm:$0xff]  }
  0x49   :  { %640 = vmatpush2.bf16.msra.mxu0 %v1650_v61 }
  0x4a   :  { %395 = vmatpush2.bf16.msra.mxu1 %v1613_v35  ;;  %641 = vmatprep.subr.bf16.mxu0 %v1655_v62  ;;  %v1670_v35 = vld [vmem:[#allocation2 + $0x264] ss:$8 sps:$4 sm:$0xff]  }
  0x4b   :  { %396 = vmatprep.subr.bf16.mxu1 %v1614_v36  ;;  %v1668_v36 = vld [vmem:[#allocation2 + $0x260] ss:$8 sps:$4 sm:$0xff]  }
  0x4d   :  { %642 = vmatpush2.bf16.msra.mxu0 %v1653_v63 }
  0x4e   :  { %397 = vmatpush2.bf16.msra.mxu1 %v1616_v37  ;;  %643 = vmatprep.subr.bf16.mxu0 %v1658_v0  ;;  %v1673_v37 = vld [vmem:[#allocation2 + $0x254] ss:$8 sps:$4 sm:$0xff]  }
  0x4f   :  { %900 = vmatprep.subr.bf16.mxu1 %v1667_v34  ;;  %v1739_v34 = vld [vmem:[#allocation2 + $0x3f4] ss:$8 sps:$4 sm:$0xff]  }
  0x51   :  { %644 = vmatpush2.bf16.msra.mxu0 %v1656_v1 }
  0x52   :  { %645 = vmatprep.subr.bf16.mxu0 %v1661_v29  ;;  %v1728_v29 = vld [vmem:[#allocation2 + $0x320] ss:$8 sps:$4 sm:$0xff]  }
  0x55   :  { %646 = vmatpush2.bf16.msra.mxu0 %v1659_v30  ;;  %v1733_v30 = vld [vmem:[#allocation2 + $0x314] ss:$8 sps:$4 sm:$0xff]  }
  0x56   :  { %647 = vmatprep.subr.bf16.mxu0 %v1664_v31  ;;  %v1731_v31 = vld [vmem:[#allocation2 + $0x310] ss:$8 sps:$4 sm:$0xff]  }
  0x59   :  { %648 = vmatpush2.bf16.msra.mxu0 %v1662_v32  ;;  %v1736_v32 = vld [vmem:[#allocation2 + $0x304] ss:$8 sps:$4 sm:$0xff]  }
  0xd7   :  { %v123_v12 = vpop.f32.mrf.mxu0 }
  0xd8   :  { %v1910_v13 = vadd.f32 %v123_v12, %v78_v8  ;;  %v1703_v8 = vld [vmem:[#allocation2 + $0x2b4] ss:$8 sps:$4 sm:$0xff]  }
  0xd9   :  { %v125_v16 = vpop.f32.mrf.mxu0  ;;  %v1709_v12 = vld [vmem:[#allocation2 + $0x294] ss:$8 sps:$4 sm:$0xff]  }
  0xda   :  { %v142_v17 = vmul.f32 %v135_v10, %v1910_v13  ;;  %v1915_v18 = vadd.f32 %v125_v16, %v82_v11  ;;  %v1706_v10 = vld [vmem:[#allocation2 + $0x2a4] ss:$8 sps:$4 sm:$0xff]   ;;  %v1704_v11 = vld [vmem:[#allocation2 + $0x2a0] ss:$8 sps:$4 sm:$0xff]  }
  0xdb   :  { %v127_v20 = vpop.f32.mrf.mxu0  ;;  %v1712_v16 = vld [vmem:[#allocation2 + $0x284] ss:$8 sps:$4 sm:$0xff]  }
  0xdc   :  { %v143_v21 = vmul.f32 %v139_v14, %v1915_v18  ;;  %v156_v22 = vadd.f32 %v149_v15, %v142_v17  ;;  %v1707_v14 = vld [vmem:[#allocation2 + $0x290] ss:$8 sps:$4 sm:$0xff]   ;;  %v1710_v15 = vld [vmem:[#allocation2 + $0x280] ss:$8 sps:$4 sm:$0xff]   ;;  %v1718_v20 = vld [vmem:[#allocation2 + $0x364] ss:$8 sps:$4 sm:$0xff]  }
  0xdd   :  { %v128_v23 = vpop.f32.mrf.mxu0  ;;  %v1713_v17 = vld [vmem:[#allocation2 + $0x370] ss:$8 sps:$4 sm:$0xff]  }
  0xde   :  { %v157_v24 = vadd.f32 %v153_v19, %v143_v21  ;;  %v158_v25 = vmax.f32 %v156_v22, 0.0  ;;  %v1715_v19 = vld [vmem:[#allocation2 + $0x374] ss:$8 sps:$4 sm:$0xff]   ;;  %v1716_v21 = vld [vmem:[#allocation2 + $0x360] ss:$8 sps:$4 sm:$0xff]  }
  0xdf   :  { %1151 = vmatprep.subr.bf16.mxu0 %v1715_v19  ;;  %v1721_v22 = vld [vmem:[#allocation2 + $0x354] ss:$8 sps:$4 sm:$0xff]   ;;  %v1719_v23 = vld [vmem:[#allocation2 + $0x350] ss:$8 sps:$4 sm:$0xff]   ;;  %v1767_v19 = vld [vmem:[%s2020_s7 + $0x60] sm:$0xff]  }
  0xe0   :  { %v159_v26 = vmax.f32 %v157_v24, 0.0  ;;  %v160_v28 = vpack.c.bf16 %v158_v25, %v158_v25  ;;  %v1724_v24 = vld [vmem:[#allocation2 + $0x344] ss:$8 sps:$4 sm:$0xff]   ;;  %v1722_v25 = vld [vmem:[#allocation2 + $0x340] ss:$8 sps:$4 sm:$0xff]  }
  0xe2   :  { %v161_v27 = vpack.c.bf16 %v159_v26, %v159_v26  ;;  %v1727_v26 = vld [vmem:[#allocation2 + $0x334] ss:$8 sps:$4 sm:$0xff]  }
  0xe4   :  { %398 = vmatprep.mubr.bf16.mxu1 %v161_v27  ;;  %v1725_v27 = vld [vmem:[#allocation2 + $0x330] ss:$8 sps:$4 sm:$0xff]  }
  0xe5   :  { %399 = vmatmul.mubr.bf16.vlgmr.msra.gmra.mxu1 %v160_v28  ;;  %v1730_v28 = vld [vmem:[#allocation2 + $0x324] ss:$8 sps:$4 sm:$0xff]  }
  0xe6   :  { %901 = vmatpush1.bf16.msra.mxu1 %v1665_v33  ;;  %v1734_v33 = vld [vmem:[#allocation2 + $0x300] ss:$8 sps:$4 sm:$0xff]  }
  0xe7   :  { %902 = vmatprep.subr.bf16.mxu1 %v1670_v35  ;;  %v1737_v35 = vld [vmem:[#allocation2 + $0x3f0] ss:$8 sps:$4 sm:$0xff]  }
  0xea   :  { %903 = vmatpush1.bf16.msra.mxu1 %v1668_v36  ;;  %v1742_v36 = vld [vmem:[#allocation2 + $0x3e4] ss:$8 sps:$4 sm:$0xff]  }
  0xeb   :  { %904 = vmatprep.subr.bf16.mxu1 %v1673_v37  ;;  %v1740_v37 = vld [vmem:[#allocation2 + $0x3e0] ss:$8 sps:$4 sm:$0xff]  }
  0xee   :  { %905 = vmatpush1.bf16.msra.mxu1 %v1671_v38  ;;  %v1745_v38 = vld [vmem:[#allocation2 + $0x3d4] ss:$8 sps:$4 sm:$0xff]  }
  0xef   :  { %906 = vmatprep.subr.bf16.mxu1 %v1676_v39  ;;  %v1743_v39 = vld [vmem:[#allocation2 + $0x3d0] ss:$8 sps:$4 sm:$0xff]  }
  0xf2   :  { %907 = vmatpush1.bf16.msra.mxu1 %v1674_v40  ;;  %v1748_v40 = vld [vmem:[#allocation2 + $0x3c4] ss:$8 sps:$4 sm:$0xff]  }
  0xf3   :  { %908 = vmatprep.subr.bf16.mxu1 %v1679_v41  ;;  %v1746_v41 = vld [vmem:[#allocation2 + $0x3c0] ss:$8 sps:$4 sm:$0xff]  }
  0xf6   :  { %909 = vmatpush1.bf16.msra.mxu1 %v1677_v42  ;;  %v1751_v42 = vld [vmem:[#allocation2 + $0x3b4] ss:$8 sps:$4 sm:$0xff]  }
  0xf7   :  { %910 = vmatprep.subr.bf16.mxu1 %v1682_v43  ;;  %v1749_v43 = vld [vmem:[#allocation2 + $0x3b0] ss:$8 sps:$4 sm:$0xff]  }
  0xfa   :  { %911 = vmatpush1.bf16.msra.mxu1 %v1680_v44  ;;  %v1754_v44 = vld [vmem:[#allocation2 + $0x3a4] ss:$8 sps:$4 sm:$0xff]  }
  0xfb   :  { %912 = vmatprep.subr.bf16.mxu1 %v1685_v45  ;;  %v1752_v45 = vld [vmem:[#allocation2 + $0x3a0] ss:$8 sps:$4 sm:$0xff]  }
  0xfe   :  { %913 = vmatpush1.bf16.msra.mxu1 %v1683_v46  ;;  %v1419_v46 = vld [vmem:[%s2017_s4 + $0x2] sm:$0x3] }
  0xff   :  { %914 = vmatprep.subr.bf16.mxu1 %v1688_v47  ;;  %v610_v47 = vrot.slane %v1419_v46, %v1894_v4 }
 0x102   :  { %915 = vmatpush1.bf16.msra.mxu1 %v1686_v48  ;;  %v1452_v48 = vld [vmem:[%s2018_s5 + $0x2] sm:$0x3] }
 0x103   :  { %916 = vmatprep.subr.bf16.mxu1 %v1691_v49  ;;  %v614_v49 = vrot.slane %v1419_v46, %v1899_v6 }
 0x106   :  { %917 = vmatpush2.bf16.msra.mxu1 %v1689_v50 }
 0x107   :  { %918 = vmatprep.subr.bf16.mxu1 %v1694_v51  ;;  %v1453_v51 = vld [vmem:[%s2019_s6 + $0x2] sm:$0x3] }
 0x10a   :  { %919 = vmatpush2.bf16.msra.mxu1 %v1692_v52 }
 0x10b   :  { %920 = vmatprep.subr.bf16.mxu1 %v1697_v53  ;;  %v666_v53 = vrot.slane %v1452_v48, %v1894_v4 }
 0x10e   :  { %921 = vmatpush2.bf16.msra.mxu1 %v1695_v54 }
 0x10f   :  { %922 = vmatprep.subr.bf16.mxu1 %v1700_v55 }
 0x112   :  { %923 = vmatpush2.bf16.msra.mxu1 %v1698_v56  ;;  %v681_v56 = vrot.slane %v1453_v51, %v1894_v4 }
 0x113   :  { %924 = vmatprep.subr.bf16.mxu1 %v1703_v8  ;;  %v1757_v8 = vld [vmem:[#allocation2 + $0x394] ss:$8 sps:$4 sm:$0xff]  }
 0x116   :  { %925 = vmatpush2.bf16.msra.mxu1 %v1701_v9  ;;  %v1755_v9 = vld [vmem:[#allocation2 + $0x390] ss:$8 sps:$4 sm:$0xff]  }
 0x117   :  { %926 = vmatprep.subr.bf16.mxu1 %v1706_v10  ;;  %v1760_v10 = vld [vmem:[#allocation2 + $0x384] ss:$8 sps:$4 sm:$0xff]  }
 0x11a   :  { %927 = vmatpush2.bf16.msra.mxu1 %v1704_v11  ;;  %v1761_v11 = vld [vmem:[%s2020_s7 + $0x78] sm:$0xff]  }
 0x11b   :  { %928 = vmatprep.subr.bf16.mxu1 %v1709_v12  ;;  %v1762_v12 = vld [vmem:[%s2020_s7 + $0x38] sm:$0xff]  }
 0x11e   :  { %929 = vmatpush2.bf16.msra.mxu1 %v1707_v14  ;;  %v1763_v14 = vld [vmem:[%s2020_s7 + $0x70] sm:$0xff]  }
 0x11f   :  { %930 = vmatprep.subr.bf16.mxu1 %v1712_v16  ;;  %v1765_v16 = vld [vmem:[%s2020_s7 + $0x68] sm:$0xff]  }
 0x122   :  { %931 = vmatpush2.bf16.msra.mxu1 %v1710_v15  ;;  %v1764_v15 = vld [vmem:[%s2020_s7 + $0x30] sm:$0xff]  }
 0x123   :  { %1536 = vmatprep.subr.bf16.mxu1 %v1761_v11 }
 0x1a5   :  { %v400_v60 = vpop.f32.mrf.mxu1 }
 0x1a6   :  { %v401_v61 = vadd.f32 %v400_v60, %v359_v58  ;;  %v670_v58 = vrot.slane %v1452_v48, %v1899_v6 }
 0x1a7   :  { %v402_v62 = vpop.f32.mrf.mxu1 }
 0x1a8   :  { %v403_v63 = vadd.f32 %v402_v62, %v363_v59  ;;  %v407_v0 = vmax.f32 %v401_v61, 0.0  ;;  %v685_v62 = vrot.slane %v1453_v51, %v1899_v6 }
 0x1a9   :  { %v404_v1 = vpop.f32.mrf.mxu1 }
 0x1aa   :  { %v408_v2 = vmax.f32 %v403_v63, 0.0  ;;  %v409_v7 = vpack.c.bf16 %v407_v0, %v407_v0 }
 0x1ab   :  { %v405_v3 = vpop.f32.mrf.mxu1 }
 0x1ac   :  { %v410_v5 = vpack.c.bf16 %v408_v2, %v408_v2 }
 0x1ae   :  { %649 = vmatprep.mubr.bf16.mxu0 %v410_v5 }
 0x1af   :  { %650 = vmatmul.mubr.bf16.vlgmr.msra.gmra.mxu0 %v409_v7 }
 0x1b0   :  { %1152 = vmatpush1.bf16.msra.mxu0 %v1713_v17  ;;  %v1766_v17 = vld [vmem:[%s2020_s7 + $0x28] sm:$0xff]  }
 0x1b1   :  { %1153 = vmatprep.subr.bf16.mxu0 %v1718_v20  ;;  %v1768_v20 = vld [vmem:[%s2020_s7 + $0x20] sm:$0xff]  }
 0x1b4   :  { %1154 = vmatpush1.bf16.msra.mxu0 %v1716_v21  ;;  %v1769_v21 = vld [vmem:[%s2020_s7 + $0x58] sm:$0xff]  }
 0x1b5   :  { %1155 = vmatprep.subr.bf16.mxu0 %v1721_v22  ;;  %v1770_v22 = vld [vmem:[%s2020_s7 + $0x18] sm:$0xff]  }
 0x1b8   :  { %1156 = vmatpush1.bf16.msra.mxu0 %v1719_v23  ;;  %v1771_v23 = vld [vmem:[%s2020_s7 + $0x50] sm:$0xff]  }
 0x1b9   :  { %1157 = vmatprep.subr.bf16.mxu0 %v1724_v24  ;;  %v1772_v24 = vld [vmem:[%s2020_s7 + $0x10] sm:$0xff]  }
 0x1bc   :  { %1158 = vmatpush1.bf16.msra.mxu0 %v1722_v25  ;;  %v1454_v25 = vld [vmem:[%s2017_s4 + $0x4] sm:$0x3] }
 0x1bd   :  { %1159 = vmatprep.subr.bf16.mxu0 %v1727_v26  ;;  %v893_v26 = vrot.slane %v1454_v25, %v1894_v4 }
 0x1c0   :  { %1160 = vmatpush1.bf16.msra.mxu0 %v1725_v27  ;;  %v897_v27 = vrot.slane %v1454_v25, %v1899_v6 }
 0x1c1   :  { %1161 = vmatprep.subr.bf16.mxu0 %v1730_v28 }
 0x1c4   :  { %1162 = vmatpush1.bf16.msra.mxu0 %v1728_v29 }
 0x1c5   :  { %1163 = vmatprep.subr.bf16.mxu0 %v1733_v30 }
 0x1c8   :  { %1164 = vmatpush1.bf16.msra.mxu0 %v1731_v31 }
 0x1c9   :  { %1165 = vmatprep.subr.bf16.mxu0 %v1736_v32 }
 0x1cc   :  { %1166 = vmatpush1.bf16.msra.mxu0 %v1734_v33 }
 0x1cd   :  { %1167 = vmatprep.subr.bf16.mxu0 %v1739_v34 }
 0x1d0   :  { %1168 = vmatpush2.bf16.msra.mxu0 %v1737_v35 }
 0x1d1   :  { %1169 = vmatprep.subr.bf16.mxu0 %v1742_v36 }
 0x1d4   :  { %1170 = vmatpush2.bf16.msra.mxu0 %v1740_v37 }
 0x1d5   :  { %1171 = vmatprep.subr.bf16.mxu0 %v1745_v38  ;;  %v1773_v38 = vld [vmem:[%s2020_s7 + $0x48] sm:$0xff]  }
 0x1d8   :  { %1172 = vmatpush2.bf16.msra.mxu0 %v1743_v39  ;;  %v1774_v39 = vld [vmem:[%s2020_s7 + $0x8] sm:$0xff]  }
 0x1d9   :  { %1173 = vmatprep.subr.bf16.mxu0 %v1748_v40  ;;  %v1775_v40 = vld [vmem:[%s2020_s7 + $0x40] sm:$0xff]  }
 0x1dc   :  { %1174 = vmatpush2.bf16.msra.mxu0 %v1746_v41  ;;  %v1776_v41 = vld [vmem:[%s2020_s7] sm:$0xff]  }
 0x1dd   :  { %1175 = vmatprep.subr.bf16.mxu0 %v1751_v42  ;;  %v1487_v42 = vld [vmem:[%s2017_s4 + $0x6] sm:$0x3] }
 0x1e0   :  { %1176 = vmatpush2.bf16.msra.mxu0 %v1749_v43  ;;  %v1144_v43 = vrot.slane %v1487_v42, %v1894_v4  ;;  %v1228_v4 = vld [vmem:[%s2021_s8] sm:$0x1] }
 0x1e1   :  { %1177 = vmatprep.subr.bf16.mxu0 %v1754_v44  ;;  %v1148_v44 = vrot.slane %v1487_v42, %v1899_v6 }
 0x1e4   :  { %1178 = vmatpush2.bf16.msra.mxu0 %v1752_v45 }
 0x1e5   :  { %1179 = vmatprep.subr.bf16.mxu0 %v1757_v8 }
 0x1e8   :  { %1180 = vmatpush2.bf16.msra.mxu0 %v1755_v9 }
 0x1e9   :  { %1181 = vmatprep.subr.bf16.mxu0 %v1760_v10 }
 0x26f   :  { %v651_v50 = vpop.f32.mrf.mxu0 }
 0x270   :  { %v652_v52 = vadd.f32 %v651_v50, %v610_v47 }
 0x271   :  { %v653_v54 = vpop.f32.mrf.mxu0 }
 0x272   :  { %v1937_v55 = vadd.f32 %v652_v52, %v1910_v13  ;;  %v654_v57 = vadd.f32 %v653_v54, %v614_v49 }
 0x273   :  { %v655_v59 = vpop.f32.mrf.mxu0 }
 0x274   :  { %v673_v60 = vmul.f32 %v666_v53, %v1937_v55  ;;  %v1943_v61 = vadd.f32 %v654_v57, %v1915_v18  ;;  %v1758_v18 = vld [vmem:[#allocation2 + $0x380] ss:$8 sps:$4 sm:$0xff]  }
 0x275   :  { %v656_v63 = vpop.f32.mrf.mxu0  ;;  %1182 = vmatpush2.bf16.msra.mxu0 %v1758_v18 }
 0x276   :  { %v688_v0 = vadd.f32 %v681_v56, %v673_v60  ;;  %v674_v1 = vmul.f32 %v670_v58, %v1943_v61 }
 0x278   :  { %v689_v2 = vadd.f32 %v685_v62, %v674_v1  ;;  %v690_v13 = vmax.f32 %v688_v0, 0.0 }
 0x27a   :  { %v691_v3 = vmax.f32 %v689_v2, 0.0  ;;  %v692_v7 = vpack.c.bf16 %v690_v13, %v690_v13 }
 0x27c   :  { %v693_v5 = vpack.c.bf16 %v691_v3, %v691_v3 }
 0x27e   :  { %932 = vmatprep.mubr.bf16.mxu1 %v693_v5 }
 0x27f   :  { %933 = vmatmul.mubr.bf16.vlgmr.msra.gmra.mxu1 %v692_v7 }
 0x280   :  { %1537 = vmatpush3.bf16.msra.mxu1 %v1762_v12 }
 0x281   :  { %1538 = vmatprep.subr.bf16.mxu1 %v1763_v14 }
 0x284   :  { %1539 = vmatpush3.bf16.msra.mxu1 %v1764_v15 }
 0x285   :  { %1540 = vmatprep.subr.bf16.mxu1 %v1765_v16 }
 0x288   :  { %1541 = vmatpush3.bf16.msra.mxu1 %v1766_v17 }
 0x289   :  { %1542 = vmatprep.subr.bf16.mxu1 %v1767_v19 }
 0x28c   :  { %1543 = vmatpush3.bf16.msra.mxu1 %v1768_v20 }
 0x28d   :  { %1544 = vmatprep.subr.bf16.mxu1 %v1769_v21 }
 0x290   :  { %1545 = vmatpush3.bf16.msra.mxu1 %v1770_v22 }
 0x291   :  { %1546 = vmatprep.subr.bf16.mxu1 %v1771_v23 }
 0x294   :  { %1547 = vmatpush3.bf16.msra.mxu1 %v1772_v24 }
 0x295   :  { %1548 = vmatprep.subr.bf16.mxu1 %v1773_v38 }
 0x298   :  { %1549 = vmatpush3.bf16.msra.mxu1 %v1774_v39 }
 0x299   :  { %1550 = vmatprep.subr.bf16.mxu1 %v1775_v40 }
 0x29c   :  { %1551 = vmatpush3.bf16.msra.mxu1 %v1776_v41 }
 0x33f   :  { %v934_v28 = vpop.f32.mrf.mxu1 }
 0x340   :  { %v935_v29 = vadd.f32 %v934_v28, %v893_v26 }
 0x341   :  { %v936_v30 = vpop.f32.mrf.mxu1 }
 0x342   :  { %v937_v31 = vadd.f32 %v936_v30, %v897_v27  ;;  %v941_v32 = vmax.f32 %v935_v29, 0.0 }
 0x343   :  { %v938_v33 = vpop.f32.mrf.mxu1 }
 0x344   :  { %v942_v34 = vmax.f32 %v937_v31, 0.0  ;;  %v943_v37 = vpack.c.bf16 %v941_v32, %v941_v32 }
 0x345   :  { %v939_v35 = vpop.f32.mrf.mxu1 }
 0x346   :  { %v944_v36 = vpack.c.bf16 %v942_v34, %v942_v34 }
 0x348   :  { %1183 = vmatprep.mubr.bf16.mxu0 %v944_v36 }
 0x349   :  { %1184 = vmatmul.mubr.bf16.vlgmr.msra.gmra.mxu0 %v943_v37 }
 0x409   :  { %v1185_v45 = vpop.f32.mrf.mxu0 }
 0x40a   :  { %v1186_v46 = vadd.f32 %v1185_v45, %v1144_v43 }
 0x40b   :  { %v1187_v47 = vpop.f32.mrf.mxu0 }
 0x40c   :  { %v1188_v48 = vadd.f32 %v1187_v47, %v1148_v44  ;;  %v1192_v49 = vadd.f32 %v1186_v46, %v1937_v55 }
 0x40d   :  { %v1189_v50 = vpop.f32.mrf.mxu0 }
 0x40e   :  { %v1193_v51 = vadd.f32 %v1188_v48, %v1943_v61  ;;  %v1194_v54 = vpack.c.bf16 %v1192_v49, %v1192_v49 }
 0x40f   :  { %v1190_v52 = vpop.f32.mrf.mxu0 }
 0x410   :  { %v1195_v53 = vpack.c.bf16 %v1193_v51, %v1193_v51 }
 0x412   :  { %1357 = vmatprep.mubr.bf16.mxu1 %v1195_v53 }
 0x413   :  { %1358 = vmatmul.mubr.bf16.vlgmr.msra.gmra.mxu1 %v1194_v54 }
 0x4d3   :  { %v1552_v56 = vpop.f32.mrf.mxu1 }
 0x4d5   :  { %v1553_v6 = vpop.f32.mrf.mxu1 }
 0x4d6   :  { %v1554_v57 = vadd.f32 %v1553_v6, %v1552_v56 }
 0x4d7   :  { %v1555_v58 = vpop.f32.mrf.mxu1 }
 0x4d8   :  { %v1360_v55 = vadd.f32 %v1554_v57, %v1228_v4 }
 0x4d9   :  { %v1556_v59 = vpop.f32.mrf.mxu1 }
 0x4da   :  { %1366 = vst.msk [vmem:[#allocation5] sm:$0x1] %vm1365_vm1, %v1360_v55 }
 0x4db   :  { %1808 = shalt.err (!%p1805_p9)
}
 0x4dc   :  { %1376 = dma.vmem_to_hbm [thread:$0]  %s1374_s23, 16, %s2022_s9, [#allocation4]  }
 0x4dd   :  { %1819 = dma.done.wait [#allocation4], 16  }
 0x4de   :  { %1820 = vsyncadd [#allocation4], 4294967280 }
 0x4df   :  { %1380 = vsyncpa [#allocation3], 1 }
 0x4e0   :  { %1381 = vsyncpa [#allocation4], 1 }

</bundles_post_ra>
